<compile_context>
chip_gen: v7x
topology: tpu7x:2x2x1
jax: 0.10.0
libtpu: 0.0.40
codegen_flags: <defaults>
</compile_context>

<pallas_src>
import functools

import jax
import jax.numpy as jnp
from jax.experimental import pallas as pl
from jax.experimental.pallas import tpu as pltpu

BN_EPS = 1e-5
# Safe scoped-VMEM ceiling on every generation (v7x physical is 64 MiB/TC).
_VMEM_LIMIT = 48 * 1024 * 1024


def _round_up(x: int, m: int) -> int:
    return ((x + m - 1) // m) * m


def stats_kernel(patches_ref, w_ref, stats_ref):
    """Pass A: conv tile -> accumulate per-channel sum / sum-of-squares (global BN stats)."""
    i = pl.program_id(0)
    conv = jnp.dot(patches_ref[...], w_ref[...],
                   preferred_element_type=jnp.float32)        # (tile, C_pad) f32
    s = jnp.sum(conv, axis=0, keepdims=True)                  # (1, C_pad)
    sq = jnp.sum(conv * conv, axis=0, keepdims=True)          # (1, C_pad)

    @pl.when(i == 0)
    def _():
        stats_ref[...] = jnp.zeros_like(stats_ref)

    stats_ref[...] += jnp.concatenate([s, sq], axis=0)        # (2, C_pad) resident accumulator


def bn_relu_kernel(patches_ref, w_ref, stats_ref, gb_ref, o_ref, *, inv_rows):
    """Pass B: conv (im2col matmul) -> folded BN scale/shift -> ReLU."""
    conv = jnp.dot(patches_ref[...], w_ref[...],
                   preferred_element_type=jnp.float32)        # (tile, C_pad) f32
    mean = stats_ref[0:1, :] * inv_rows
    var = stats_ref[1:2, :] * inv_rows - mean * mean          # biased var = E[x^2] - E[x]^2
    scale = gb_ref[0:1, :] * jax.lax.rsqrt(var + BN_EPS)      # gamma * rsqrt(var+eps)
    shift = gb_ref[1:2, :] - mean * scale                     # beta - mean*scale
    o_ref[...] = jnp.maximum(conv * scale + shift, 0.0)


def downblock_forward(x_nchw, w, b, gamma, beta, *, tile_m=256):
    """x_nchw: (N, Cin, H, W); w: (Cout, Cin, 3, 3); b/gamma/beta: (Cout,).

    The conv bias is mathematically cancelled by train-mode BN mean subtraction,
    so it is dropped from the hot path (dead work).
    """
    del b  # exactly cancelled by BN's mean subtraction in training mode

    N, Cin, H, W = x_nchw.shape
    Cout = w.shape[0]
    Ho = (H + 2 * 1 - 3) // 2 + 1
    Wo = (W + 2 * 1 - 3) // 2 + 1
    rows = N * Ho * Wo
    K = 9 * Cin

    # Lane-dense padding of the contraction and output-channel dims.
    C_pad = _round_up(Cout, 128)
    K_pad = _round_up(K, 128)

    # --- glue: NHWC + zero-pad + im2col (plain JAX), bf16 for the MXU ---
    # TODO(synk): eliminate the materialized im2col by accumulating the 9 shifted
    # tap-matmuls in-kernel (strided windows of the padded NHWC input) to remove
    # the extra HBM round-trip of the patch matrix.
    x = jnp.transpose(x_nchw, (0, 2, 3, 1)).astype(jnp.bfloat16)      # NHWC
    xp = jnp.pad(x, ((0, 0), (1, 1), (1, 1), (0, 0)))                 # zero pad=1
    taps = [xp[:, kh:kh + 2 * Ho:2, kw:kw + 2 * Wo:2, :]
            for kh in range(3) for kw in range(3)]                    # 9 x (N,Ho,Wo,Cin)
    patches = jnp.stack(taps, axis=3).reshape(rows, K)                # (rows, 9*Cin) bf16

    # Row tiling: >=256 is a good default on v6e; halve if the double-buffered
    # working set approaches v7x's 64 MiB VMEM.
    tile = min(tile_m, _round_up(rows, 8))
    rows_pad = _round_up(rows, tile)
    num_tiles = rows_pad // tile

    # Zero-padded rows produce conv == 0 (no bias), so they do not perturb the
    # accumulated sum/sumsq; stats are divided by the true row count.
    patches = jnp.pad(patches, ((0, rows_pad - rows), (0, K_pad - K)))

    # Weights: (Cout,Cin,3,3) -> (kh,kw,Cin,Cout) -> (9*Cin, Cout), bf16, zero-padded.
    w2 = jnp.transpose(w, (2, 3, 1, 0)).reshape(K, Cout).astype(jnp.bfloat16)
    w2 = jnp.pad(w2, ((0, K_pad - K), (0, C_pad - Cout)))

    # gamma/beta collapsed into one lane-dense (2, C_pad) f32 array.
    gb = jnp.stack([gamma, beta], axis=0).astype(jnp.float32)
    gb = jnp.pad(gb, ((0, 0), (0, C_pad - Cout)))

    # ---- pass A: global BN statistics accumulated across row tiles ----
    stats = pl.pallas_call(
        stats_kernel,
        out_shape=jax.ShapeDtypeStruct((2, C_pad), jnp.float32),
        grid=(num_tiles,),
        in_specs=[
            pl.BlockSpec((tile, K_pad), lambda i: (i, 0)),
            pl.BlockSpec((K_pad, C_pad), lambda i: (0, 0)),
        ],
        out_specs=pl.BlockSpec((2, C_pad), lambda i: (0, 0)),
        compiler_params=pltpu.CompilerParams(
            dimension_semantics=("arbitrary",),   # output accumulator resident across rows
            vmem_limit_bytes=_VMEM_LIMIT),
    )(patches, w2)

    # ---- pass B: conv + fused BN scale/shift + ReLU, parallel over row tiles ----
    out = pl.pallas_call(
        functools.partial(bn_relu_kernel, inv_rows=1.0 / rows),
        out_shape=jax.ShapeDtypeStruct((rows_pad, C_pad), jnp.float32),
        grid=(num_tiles,),
        in_specs=[
            pl.BlockSpec((tile, K_pad), lambda i: (i, 0)),
            pl.BlockSpec((K_pad, C_pad), lambda i: (0, 0)),
            pl.BlockSpec((2, C_pad), lambda i: (0, 0)),
            pl.BlockSpec((2, C_pad), lambda i: (0, 0)),
        ],
        out_specs=pl.BlockSpec((tile, C_pad), lambda i: (i, 0)),
        compiler_params=pltpu.CompilerParams(
            dimension_semantics=("parallel",),    # rows independent; v7x splits over 2 TCs
            vmem_limit_bytes=_VMEM_LIMIT),
    )(patches, w2, stats, gb)

    # Slice off padding, back to NCHW.
    out = out[:rows, :Cout].reshape(N, Ho, Wo, Cout)
    return jnp.transpose(out, (0, 3, 1, 2))


def reference_forward(x_nchw, w, b, gamma, beta):
    """Pure-JAX reference (lax conv + bias + train-mode BN + ReLU).

    Inputs are rounded to bf16 to model the kernel's bf16 MXU inputs. The bias is
    kept here on purpose: it must be cancelled by BN's mean subtraction, which the
    comparison verifies.
    """
    xf = x_nchw.astype(jnp.bfloat16).astype(jnp.float32)
    wf = w.astype(jnp.bfloat16).astype(jnp.float32)
    conv = jax.lax.conv_general_dilated(
        xf, wf, window_strides=(2, 2), padding=((1, 1), (1, 1)),
        dimension_numbers=("NCHW", "OIHW", "NCHW"))
    conv = conv + b.reshape(1, -1, 1, 1)
    mean = jnp.mean(conv, axis=(0, 2, 3), keepdims=True)
    var = jnp.mean((conv - mean) ** 2, axis=(0, 2, 3), keepdims=True)
    xhat = (conv - mean) * jax.lax.rsqrt(var + BN_EPS)
    y = xhat * gamma.reshape(1, -1, 1, 1) + beta.reshape(1, -1, 1, 1)
    return jnp.maximum(y, 0.0)


if __name__ == "__main__":
    # small shapes consistent with the module: N=2, Cin=4, H=W=16, Cout=8
    N, Cin, H, W, Cout = 2, 4, 16, 16, 8
    key = jax.random.PRNGKey(0)
    kx, kw, kb = jax.random.split(key, 3)

    x = jax.random.normal(kx, (N, Cin, H, W), dtype=jnp.float32)
    fan_in = Cin * 3 * 3
    bound = 1.0 / (fan_in ** 0.5)
    w = jax.random.uniform(kw, (Cout, Cin, 3, 3), jnp.float32, -bound, bound)
    b = jax.random.uniform(kb, (Cout,), jnp.float32, -bound, bound)
    gamma = jnp.ones((Cout,), jnp.float32)   # BatchNorm2d default weight
    beta = jnp.zeros((Cout,), jnp.float32)   # BatchNorm2d default bias

    out = jax.block_until_ready(downblock_forward(x, w, b, gamma, beta))
    ref = jax.block_until_ready(reference_forward(x, w, b, gamma, beta))

    assert out.shape == (N, Cout, H // 2, W // 2), out.shape
    assert jnp.allclose(out, ref, atol=2e-4, rtol=2e-4), \
        float(jnp.max(jnp.abs(out - ref)))

    print("KERNEL_OK")
</pallas_src>

<mosaic_0001>
module attributes {stable_mosaic.version = 11 : i64} {
  func.func @stats_kernel(%arg0: i32, %arg1: memref<128x128xbf16, #tpu.memory_space<vmem>>, %arg2: memref<128x128xbf16, #tpu.memory_space<vmem>>, %arg3: memref<2x128xf32, #tpu.memory_space<vmem>>) attributes {dimension_semantics = [#tpu.dimension_semantics<arbitrary>], iteration_bounds = array<i64: 1>, scalar_prefetch = 0 : i64, scratch_operands = 0 : i64, tpu.core_type = #tpu.core_type<tc>, window_params = [{transform_indices = @transform_0, window_bounds = array<i64: 128, 128>}, {pipeline_mode = #tpu.pipeline_mode<synchronous>, transform_indices = @transform_1, window_bounds = array<i64: 128, 128>}, {pipeline_mode = #tpu.pipeline_mode<synchronous>, transform_indices = @transform_2, window_bounds = array<i64: 2, 128>}]} {
    %c0 = arith.constant 0 : index
    %c0_0 = arith.constant 0 : index
    %0 = vector.load %arg1[%c0, %c0_0] : memref<128x128xbf16, #tpu.memory_space<vmem>>, vector<128x128xbf16>
    %c0_1 = arith.constant 0 : index
    %c0_2 = arith.constant 0 : index
    %1 = vector.load %arg2[%c0_1, %c0_2] : memref<128x128xbf16, #tpu.memory_space<vmem>>, vector<128x128xbf16>
    %cst = arith.constant dense<0.000000e+00> : vector<128x128xf32>
    %2 = tpu.matmul %0, %1, %cst {dimension_numbers = #tpu.dot_dimension_numbers<[1], [0], [0], [1], [0, 0, 1, 1], [], []>} : vector<128x128xbf16>, vector<128x128xbf16>, vector<128x128xf32> -> vector<128x128xf32>
    %cst_3 = arith.constant dense<0.000000e+00> : vector<128xf32>
    %3 = vector.multi_reduction <add>, %2, %cst_3 [0] : vector<128x128xf32> to vector<128xf32>
    %4 = vector.shape_cast %3 : vector<128xf32> to vector<1x128xf32>
    %5 = arith.mulf %2, %2 : vector<128x128xf32>
    %cst_4 = arith.constant dense<0.000000e+00> : vector<128xf32>
    %6 = vector.multi_reduction <add>, %5, %cst_4 [0] : vector<128x128xf32> to vector<128xf32>
    %7 = vector.shape_cast %6 : vector<128xf32> to vector<1x128xf32>
    %c0_i32 = arith.constant 0 : i32
    %8 = arith.cmpi eq, %arg0, %c0_i32 : i32
    %9 = arith.extui %8 : i1 to i32
    %c0_i32_5 = arith.constant 0 : i32
    %10 = arith.cmpi ne, %9, %c0_i32_5 : i32
    scf.if %10 {
      %cst_10 = arith.constant 0.000000e+00 : f32
      %15 = vector.broadcast %cst_10 : f32 to vector<2x128xf32>
      %c0_11 = arith.constant 0 : index
      %c0_12 = arith.constant 0 : index
      %16 = vector.load %arg3[%c0_11, %c0_12] : memref<2x128xf32, #tpu.memory_space<vmem>>, vector<2x128xf32>
      tpu.vector_store %arg3[%c0_11, %c0_12], %15 {strides = array<i32>} : memref<2x128xf32, #tpu.memory_space<vmem>>, vector<2x128xf32>,
    } else {
    }
    %c0_6 = arith.constant 0 : index
    %c0_7 = arith.constant 0 : index
    %11 = vector.load %arg3[%c0_6, %c0_7] : memref<2x128xf32, #tpu.memory_space<vmem>>, vector<2x128xf32>
    %12 = tpu.concatenate %4, %7 in 0 : vector<1x128xf32>, vector<1x128xf32> -> vector<2x128xf32>
    %13 = arith.addf %11, %12 : vector<2x128xf32>
    %c0_8 = arith.constant 0 : index
    %c0_9 = arith.constant 0 : index
    %14 = vector.load %arg3[%c0_8, %c0_9] : memref<2x128xf32, #tpu.memory_space<vmem>>, vector<2x128xf32>
    tpu.vector_store %arg3[%c0_8, %c0_9], %13 {strides = array<i32>} : memref<2x128xf32, #tpu.memory_space<vmem>>, vector<2x128xf32>,
    return
  }
  func.func @transform_0(%arg0: i32) -> (i32, i32) {
    %c0_i32 = arith.constant 0 : i32
    %c0_i32_0 = arith.constant 0 : i32
    return %arg0, %c0_i32 : i32, i32
  }
  func.func @transform_1(%arg0: i32) -> (i32, i32) {
    %c0_i32 = arith.constant 0 : i32
    %c0_i32_0 = arith.constant 0 : i32
    %c0_i32_1 = arith.constant 0 : i32
    return %c0_i32, %c0_i32_0 : i32, i32
  }
  func.func @transform_2(%arg0: i32) -> (i32, i32) {
    %c0_i32 = arith.constant 0 : i32
    %c0_i32_0 = arith.constant 0 : i32
    %c0_i32_1 = arith.constant 0 : i32
    return %c0_i32, %c0_i32_0 : i32, i32
  }
}

</mosaic_0001>

<bundles_post_ra>
// kernel: tpu_custom_call.1
= control target key start
LH: loop header
LB: loop body
LE: loop exit
PB: predicated region body
PF: predicated region fallthrough
CT: control target
= control target key end

     0   :  { %7 = vsyncpa [#allocation3], 0  ;;  %s581_s0 = inlined_call_operand.hbm [shape: bf16[128,128], index: 0, kind: input, shape index: {}]   ;;  %s582_s1 = inlined_call_operand.hbm [shape: bf16[128,128], index: 1, kind: input, shape index: {}]   ;;  %s583_s2 = inlined_call_operand.hbm [shape: f32[2,128], index: 2, kind: output, shape index: {}]  }
   0x1   :  { %8 = vsyncpa [#allocation6], 0 }
   0x2   :  { %9 = vsyncpa [#allocation4], 0  ;;  %s524_s9 = smov [#allocation2]   ;;  %s452_s13 = scalar_lea.hbm %s581_s0, 1024 }
   0x3   :  { %s15_s10 = sshll.u32 %s524_s9, 4  ;;  %p453_p0 = scmp.ne.s32.totalorder %s581_s0, %s452_s13  ;;  %s16_s10 = int_to_ptr.vmem [resolvable:$true] %s15_s10 }
   0x4   :  { %p456_p1 = scmp.lt.u32.totalorder %s452_s13, %s581_s0 }
   0x6   :  { %p458_p2 = pnand %p456_p1, %p453_p0 }
   0x8   :  { %461 = shalt.err (!%p458_p2)
}
   0x9   :  { %s462_s18 = scalar_lea.vmem %s16_s10, 1024  ;;  %p467_p4 = scmp.lt.s32.totalorder %s16_s10, %s16_s10 }
   0xa   :  { %p463_p3 = scmp.ne.s32.totalorder %s16_s10, %s462_s18  ;;  %p468_p5 = scmp.lt.s32.totalorder %s462_s18, %s462_s18 }
   0xc   :  { %p469_p6 = por %p468_p5, %p467_p4 }
   0xe   :  { %p470_p7 = pnand %p469_p6, %p463_p3 }
  0x10   :  { %473 = shalt.err (!%p470_p7)
}
  0x11   :  { %s525_s19 = smov 64   ;;  %s526_s20 = smov 4  }
  0x12   :  { %21 = dma.hbm_to_vmem [thread:$0]  %s581_s0, 1024, %s16_s10, [#allocation3], %s525_s19, %s525_s19, %s526_s20  }
  0x13   :  { %s527_s23 = smov [#allocation5]   ;;  %s474_s27 = scalar_lea.hbm %s582_s1, 1024 }
  0x14   :  { %s27_s24 = sshll.u32 %s527_s23, 4  ;;  %p475_p8 = scmp.ne.s32.totalorder %s582_s1, %s474_s27  ;;  %s28_s24 = int_to_ptr.vmem [resolvable:$true] %s27_s24 }
  0x15   :  { %p478_p9 = scmp.lt.u32.totalorder %s474_s27, %s582_s1 }
  0x17   :  { %p480_p10 = pnand %p478_p9, %p475_p8 }
  0x19   :  { %483 = shalt.err (!%p480_p10)
}
  0x1a   :  { %s484_s4 = scalar_lea.vmem %s28_s24, 1024  ;;  %p489_p12 = scmp.lt.s32.totalorder %s28_s24, %s28_s24 }
  0x1b   :  { %p485_p11 = scmp.ne.s32.totalorder %s28_s24, %s484_s4  ;;  %p490_p13 = scmp.lt.s32.totalorder %s484_s4, %s484_s4 }
  0x1d   :  { %p491_p0 = por %p490_p13, %p489_p12 }
  0x1f   :  { %p492_p1 = pnand %p491_p0, %p485_p11 }
  0x21   :  { %495 = shalt.err (!%p492_p1)
}
  0x22   :  { %33 = dma.hbm_to_vmem [thread:$0]  %s582_s1, 1024, %s28_s24, [#allocation6], %s525_s19, %s525_s19, %s526_s20  }
  0x23   :  { %518 = dma.done.wait [#allocation3], 1024  }
  0x24   :  { %519 = vsyncadd [#allocation3], 4294966272 }
  0x25   :  { %520 = dma.done.wait [#allocation6], 1024  }
  0x26   :  { %521 = vsyncadd [#allocation6], 4294966272  ;;  %v436_v0 = vld [vmem:[#allocation5] sm:$0xff]   ;;  %v437_v1 = vld [vmem:[#allocation5 + $0x8] sm:$0xff]   ;;  %v528_v16 = vmov 0.0   ;;  %vm330_vm0 = vcmask 1040384  }
  0x27   :  { %382 = vmatprep.subr.bf16.mxu0 %v436_v0  ;;  %414 = vmatprep.subr.bf16.mxu1 %v436_v0  ;;  %v438_v2 = vld [vmem:[#allocation5 + $0x10] sm:$0xff]   ;;  %v439_v3 = vld [vmem:[#allocation5 + $0x18] sm:$0xff]   ;;  %v444_v4 = vld [vmem:[#allocation2] sm:$0xff]   ;;  %328 = vst [vmem:[#allocation7] sm:$0x3] %v528_v16  ;;  %s529_s1 = smov [#allocation7]  }
  0x28   :  { %383 = vmatpush3.bf16.msra.mxu0 %v436_v0  ;;  %422 = vmatpush3.bf16.msra.mxu1 %v436_v0  ;;  %v440_v5 = vld [vmem:[#allocation5 + $0x20] sm:$0xff]   ;;  %v441_v7 = vld [vmem:[#allocation5 + $0x28] sm:$0xff]   ;;  %v442_v8 = vld [vmem:[#allocation5 + $0x30] sm:$0xff]   ;;  %s340_s6 = sshll.u32 %s529_s1, 4  ;;  %s341_s6 = int_to_ptr.vmem [resolvable:$true] %s340_s6 }
  0x29   :  { %384 = vmatprep.subr.bf16.mxu0 %v437_v1  ;;  %415 = vmatprep.subr.bf16.mxu1 %v437_v1  ;;  %v448_v6 = vld [vmem:[#allocation2 + $0x20] sm:$0xff]   ;;  %v443_v9 = vld [vmem:[#allocation5 + $0x38] sm:$0xff]   ;;  %v445_v10 = vld [vmem:[#allocation2 + $0x8] sm:$0xff]   ;;  %s496_s7 = scalar_lea.vmem %s341_s6, 32  ;;  %p501_p3 = scmp.lt.s32.totalorder %s341_s6, %s341_s6 }
  0x2a   :  { %398 = vmatprep.mubr.bf16.mxu0 %v444_v4  ;;  %406 = vmatprep.mubr.bf16.mxu1 %v448_v6  ;;  %v449_v11 = vld [vmem:[#allocation2 + $0x28] sm:$0xff]   ;;  %v446_v12 = vld [vmem:[#allocation2 + $0x10] sm:$0xff]   ;;  %v447_v14 = vld [vmem:[#allocation2 + $0x18] sm:$0xff]   ;;  %p497_p2 = scmp.ne.s32.totalorder %s341_s6, %s496_s7  ;;  %p502_p4 = scmp.lt.s32.totalorder %s496_s7, %s496_s7 }
  0x2b   :  { %v450_v13 = vld [vmem:[#allocation2 + $0x30] sm:$0xff]   ;;  %v451_v15 = vld [vmem:[#allocation2 + $0x38] sm:$0xff]  }
  0x2c   :  { %385 = vmatpush3.bf16.msra.mxu0 %v437_v1  ;;  %423 = vmatpush3.bf16.msra.mxu1 %v437_v1  ;;  %p503_p5 = por %p502_p4, %p501_p3 }
  0x2d   :  { %386 = vmatprep.subr.bf16.mxu0 %v438_v2  ;;  %416 = vmatprep.subr.bf16.mxu1 %v438_v2 }
  0x2e   :  { %p504_p6 = pnand %p503_p5, %p497_p2 }
  0x30   :  { %387 = vmatpush3.bf16.msra.mxu0 %v438_v2  ;;  %424 = vmatpush3.bf16.msra.mxu1 %v438_v2 }
  0x31   :  { %388 = vmatprep.subr.bf16.mxu0 %v439_v3  ;;  %417 = vmatprep.subr.bf16.mxu1 %v439_v3 }
  0x34   :  { %389 = vmatpush3.bf16.msra.mxu0 %v439_v3  ;;  %425 = vmatpush3.bf16.msra.mxu1 %v439_v3 }
  0x35   :  { %390 = vmatprep.subr.bf16.mxu0 %v440_v5  ;;  %418 = vmatprep.subr.bf16.mxu1 %v440_v5 }
  0x38   :  { %391 = vmatpush3.bf16.msra.mxu0 %v440_v5  ;;  %426 = vmatpush3.bf16.msra.mxu1 %v440_v5 }
  0x39   :  { %392 = vmatprep.subr.bf16.mxu0 %v441_v7  ;;  %419 = vmatprep.subr.bf16.mxu1 %v441_v7 }
  0x3c   :  { %393 = vmatpush3.bf16.msra.mxu0 %v441_v7  ;;  %427 = vmatpush3.bf16.msra.mxu1 %v441_v7 }
  0x3d   :  { %394 = vmatprep.subr.bf16.mxu0 %v442_v8  ;;  %420 = vmatprep.subr.bf16.mxu1 %v442_v8 }
  0x40   :  { %395 = vmatpush3.bf16.msra.mxu0 %v442_v8  ;;  %428 = vmatpush3.bf16.msra.mxu1 %v442_v8 }
  0x41   :  { %396 = vmatprep.subr.bf16.mxu0 %v443_v9  ;;  %421 = vmatprep.subr.bf16.mxu1 %v443_v9 }
  0x44   :  { %397 = vmatpush3.bf16.msra.mxu0 %v443_v9  ;;  %429 = vmatpush3.bf16.msra.mxu1 %v443_v9 }
  0x47   :  { %399 = vmatmul.mubr.bf16.vlgmr.msra.gmra.mrb[0].mxu0 %v445_v10  ;;  %407 = vmatmul.mubr.bf16.vlgmr.msra.gmra.mrb[0].mxu1 %v449_v11 }
  0x48   :  { %402 = vmatprep.mubr.bf16.mxu0 %v446_v12  ;;  %410 = vmatprep.mubr.bf16.mxu1 %v450_v13 }
  0x4f   :  { %403 = vmatmul.mubr.bf16.gmra.mrb[4].mxu0 %v447_v14  ;;  %411 = vmatmul.mubr.bf16.gmra.mrb[4].mxu1 %v451_v15 }
 0x11a   :  { %v400_v17 = vpop.f32.mrb[0].mxu0  ;;  %v408_v18 = vpop.f32.mrb[0].mxu1 }
 0x11b   :  { %v203_v19 = vpop.f32.mrb[1].mxu0  ;;  %v235_v20 = vpop.f32.mrb[1].mxu1  ;;  %v289_v28 = vmul.f32 %v400_v17, %v400_v17  ;;  %v297_v60 = vmul.f32 %v408_v18, %v408_v18 }
 0x11c   :  { %v401_v21 = vpop.f32.mrb[2].mxu0  ;;  %v409_v22 = vpop.f32.mrb[2].mxu1  ;;  %v287_v25 = vmul.f32 %v203_v19, %v203_v19  ;;  %v295_v54 = vmul.f32 %v235_v20, %v235_v20 }
 0x11d   :  { %v206_v23 = vpop.f32.mrb[3].mxu0  ;;  %v238_v24 = vpop.f32.mrb[3].mxu1  ;;  %v290_v31 = vmul.f32 %v401_v21, %v401_v21  ;;  %v298_v63 = vmul.f32 %v409_v22, %v409_v22 }
 0x11e   :  { %v266_v26 = vadd.f32 %v206_v23, %v203_v19  ;;  %v288_v27 = vmul.f32 %v206_v23, %v206_v23  ;;  %v296_v59 = vmul.f32 %v238_v24, %v238_v24 }
 0x120   :  { %v267_v29 = vadd.f32 %v400_v17, %v266_v26  ;;  %v303_v30 = vadd.f32 %v288_v27, %v287_v25  ;;  %v329_v27 = vld [vmem:[#allocation7] sm:$0x3] }
 0x122   :  { %v304_v32 = vadd.f32 %v303_v30, %v289_v28  ;;  %v404_v33 = vpop.f32.mrb[4].mxu0  ;;  %v268_v34 = vadd.f32 %v401_v21, %v267_v29  ;;  %v412_v35 = vpop.f32.mrb[4].mxu1 }
 0x123   :  { %v219_v36 = vpop.f32.mrb[5].mxu0  ;;  %v251_v37 = vpop.f32.mrb[5].mxu1  ;;  %v293_v48 = vmul.f32 %v404_v33, %v404_v33  ;;  %v301_v8 = vmul.f32 %v412_v35, %v412_v35 }
 0x124   :  { %v269_v38 = vadd.f32 %v268_v34, %v219_v36  ;;  %v291_v39 = vmul.f32 %v219_v36, %v219_v36  ;;  %v305_v40 = vadd.f32 %v304_v32, %v290_v31  ;;  %v405_v41 = vpop.f32.mrb[6].mxu0  ;;  %v413_v42 = vpop.f32.mrb[6].mxu1  ;;  %v299_v2 = vmul.f32 %v251_v37, %v251_v37 }
 0x125   :  { %v222_v43 = vpop.f32.mrb[7].mxu0  ;;  %v254_v44 = vpop.f32.mrb[7].mxu1  ;;  %v294_v51 = vmul.f32 %v405_v41, %v405_v41  ;;  %v302_v11 = vmul.f32 %v413_v42, %v413_v42 }
 0x126   :  { %v306_v45 = vadd.f32 %v305_v40, %v291_v39  ;;  %v270_v46 = vadd.f32 %v269_v38, %v222_v43  ;;  %v292_v47 = vmul.f32 %v222_v43, %v222_v43  ;;  %v300_v7 = vmul.f32 %v254_v44, %v254_v44 }
 0x128   :  { %v271_v49 = vadd.f32 %v404_v33, %v270_v46  ;;  %v307_v50 = vadd.f32 %v306_v45, %v292_v47 }
 0x12a   :  { %v308_v52 = vadd.f32 %v307_v50, %v293_v48  ;;  %v272_v53 = vadd.f32 %v405_v41, %v271_v49 }
 0x12c   :  { %v273_v55 = vadd.f32 %v272_v53, %v235_v20  ;;  %v309_v56 = vadd.f32 %v308_v52, %v294_v51 }
 0x12e   :  { %v310_v57 = vadd.f32 %v309_v56, %v295_v54  ;;  %v274_v58 = vadd.f32 %v273_v55, %v238_v24 }
 0x130   :  { %v275_v61 = vadd.f32 %v408_v18, %v274_v58  ;;  %v311_v62 = vadd.f32 %v310_v57, %v296_v59 }
 0x132   :  { %v312_v0 = vadd.f32 %v311_v62, %v297_v60  ;;  %v276_v1 = vadd.f32 %v409_v22, %v275_v61 }
 0x134   :  { %v277_v3 = vadd.f32 %v276_v1, %v251_v37  ;;  %v313_v4 = vadd.f32 %v312_v0, %v298_v63 }
 0x136   :  { %v314_v5 = vadd.f32 %v313_v4, %v299_v2  ;;  %v278_v6 = vadd.f32 %v277_v3, %v254_v44 }
 0x138   :  { %v279_v9 = vadd.f32 %v412_v35, %v278_v6  ;;  %v315_v10 = vadd.f32 %v314_v5, %v300_v7 }
 0x13a   :  { %v280_v12 = vadd.f32 %v413_v42, %v279_v9  ;;  %v316_v13 = vadd.f32 %v315_v10, %v301_v8 }
 0x13c   :  { %v281_v14 = vrot.slane %v280_v12, 4  ;;  %v317_v15 = vadd.f32 %v316_v13, %v302_v11 }
 0x13e   :  { %v282_v16 = vadd.f32 %v281_v14, %v280_v12  ;;  %v318_v17 = vrot.slane %v317_v15, 4 }
 0x140   :  { %v283_v18 = vrot.slane %v282_v16, 2  ;;  %v319_v19 = vadd.f32 %v318_v17, %v317_v15 }
 0x142   :  { %v284_v20 = vadd.f32 %v283_v18, %v282_v16  ;;  %v320_v21 = vrot.slane %v319_v19, 2 }
 0x144   :  { %v285_v22 = vrot.slane %v284_v20, 1  ;;  %v321_v23 = vadd.f32 %v320_v21, %v319_v19 }
 0x146   :  { %v322_v24 = vrot.slane %v321_v23, 1  ;;  %v286_v25 = vadd.f32 %v285_v22, %v284_v20 }
 0x148   :  { %v323_v26 = vadd.f32 %v322_v24, %v321_v23 }
 0x14a   :  { %v331_v28 = vsel %vm330_vm0, %v286_v25, %v323_v26 }
 0x14b   :  { %v332_v29 = vadd.f32 %v331_v28, %v329_v27 }
 0x14d   :  { %333 = vst [vmem:[#allocation7] sm:$0x3] %v332_v29 }
 0x14e   :  { %507 = shalt.err (!%p504_p6)
}
 0x14f   :  { %s508_s10 = scalar_lea.hbm %s583_s2, 32 }
 0x150   :  { %p509_p7 = scmp.ne.s32.totalorder %s583_s2, %s508_s10  ;;  %p512_p8 = scmp.lt.u32.totalorder %s508_s10, %s583_s2 }
 0x152   :  { %p514_p9 = pnand %p512_p8, %p509_p7 }
 0x154   :  { %517 = shalt.err (!%p514_p9)
}
 0x155   :  { %343 = dma.vmem_to_hbm [thread:$0]  %s341_s6, 32, %s583_s2, [#allocation4]  }
 0x156   :  { %522 = dma.done.wait [#allocation4], 32  }
 0x157   :  { %523 = vsyncadd [#allocation4], 4294967264 }
 0x158   :  { %347 = vsyncpa [#allocation3], 1 }
 0x159   :  { %348 = vsyncpa [#allocation6], 1 }
 0x15a   :  { %349 = vsyncpa [#allocation4], 1 }

</bundles_post_ra>
